<compile_context>
chip_gen: v5e
topology: v5e:2x2
jax: 0.10.0
libtpu: 0.0.40
codegen_flags: <defaults>
</compile_context>

<pallas_src>
import functools

import jax
import jax.numpy as jnp
from jax.experimental import pallas as pl
from jax.experimental.pallas import tpu as pltpu


def ffn_kernel(x_ref, w1_ref, b1_ref, w2_ref, b2_ref, g_ref, beta_ref,
               o_ref, acc_ref, *, eps):
    # Grid: (token tile i, dff tile k).  k is the reduction axis (last,
    # "arbitrary"); the output block and acc scratch stay resident across k.
    k = pl.program_id(1)
    nk = pl.num_programs(1)

    @pl.when(k == 0)
    def _init():
        # Residual + linear2 bias, added exactly once per token tile (f32).
        acc_ref[...] = (x_ref[...].astype(jnp.float32)
                        + b2_ref[...].astype(jnp.float32))

    # linear1 (this dff slice) + ReLU.  ReLU is elementwise so it partitions
    # cleanly along dff.  Dropout == identity in eval mode.
    h = jnp.dot(x_ref[...].astype(jnp.bfloat16), w1_ref[...],
                preferred_element_type=jnp.float32)
    h = jnp.maximum(h + b1_ref[...].astype(jnp.float32), 0.0)

    # Partial linear2, accumulated in f32.
    acc_ref[...] += jnp.dot(h.astype(jnp.bfloat16), w2_ref[...],
                            preferred_element_type=jnp.float32)

    @pl.when(k == nk - 1)
    def _finalize():
        # LayerNorm over d_model, fused into the last reduction step so the
        # EUP/XLU work hides under the next tile's weight DMAs.
        y = acc_ref[...]
        mean = jnp.mean(y, axis=-1, keepdims=True)
        var = jnp.mean((y - mean) * (y - mean), axis=-1, keepdims=True)
        y_norm = (y - mean) * jax.lax.rsqrt(var + eps)
        o_ref[...] = (y_norm * g_ref[...].astype(jnp.float32)
                      + beta_ref[...].astype(jnp.float32)).astype(o_ref.dtype)


def _round_up(a, b):
    return ((a + b - 1) // b) * b


def ffn_forward(x, w1, b1, w2, b2, gamma, beta, *, tm=256, tdff=512, eps=1e-5):
    """x: (batch, seq, d_model) float32.  Returns same shape / dtype."""
    batch, seq, d_model = x.shape
    dff = w1.shape[1]
    M = batch * seq

    # Row tile: large for MXU occupancy, shrunk for tiny inputs.  Ragged M is
    # handled by zero-padding (padded rows are dropped after the call; eps in
    # LayerNorm keeps them NaN-free).
    tm_eff = min(tm, max(8, _round_up(M, 8)))
    M_pad = _round_up(M, tm_eff)

    # dff tile: largest of {tdff, 512, 256, 128} that divides dff, else the
    # whole dff (no reduction tiling) for small / ragged dff.
    tdff_eff = dff
    for cand in (tdff, 512, 256, 128):
        if cand <= dff and dff % cand == 0:
            tdff_eff = cand
            break
    nk = dff // tdff_eff

    x2d = x.reshape(M, d_model)
    if M_pad != M:
        x2d = jnp.pad(x2d, ((0, M_pad - M), (0, 0)))

    # bf16 weights halve HBM/VMEM traffic; accumulation stays f32 in-kernel.
    w1_bf = w1.astype(jnp.bfloat16)
    w2_bf = w2.astype(jnp.bfloat16)
    b1_2d = b1.reshape(1, dff).astype(jnp.float32)
    b2_2d = b2.reshape(1, d_model).astype(jnp.float32)
    g_2d = gamma.reshape(1, d_model).astype(jnp.float32)
    beta_2d = beta.reshape(1, d_model).astype(jnp.float32)

    grid = (M_pad // tm_eff, nk)

    # VMEM budget: double-buffered x / W1 / W2 / biases / out + acc scratch.
    vmem_bytes = (
        2 * tm_eff * d_model * 4              # x tiles (f32)
        + 2 * d_model * tdff_eff * 2          # W1 tiles (bf16)
        + 2 * tdff_eff * d_model * 2          # W2 tiles (bf16)
        + 2 * (tdff_eff + 3 * d_model) * 4    # b1 / b2 / gamma / beta
        + 2 * tm_eff * d_model * 4            # output tiles
        + tm_eff * d_model * 4                # accumulator scratch
    )
    vmem_limit = min(max(2 * vmem_bytes + (4 << 20), 32 << 20), 64 << 20)

    cost = pl.CostEstimate(
        flops=4 * M * d_model * dff,          # two matmuls
        transcendentals=M_pad,                # one rsqrt per row
        bytes_accessed=(x2d.size * 4 + w1_bf.size * 2 + w2_bf.size * 2
                        + M_pad * d_model * 4),
    )

    out2d = pl.pallas_call(
        functools.partial(ffn_kernel, eps=eps),
        out_shape=jax.ShapeDtypeStruct((M_pad, d_model), x.dtype),
        grid_spec=pltpu.PrefetchScalarGridSpec(
            num_scalar_prefetch=0,
            grid=grid,
            in_specs=[
                pl.BlockSpec((tm_eff, d_model), lambda i, k: (i, 0)),    # x
                pl.BlockSpec((d_model, tdff_eff), lambda i, k: (0, k)),  # W1
                pl.BlockSpec((1, tdff_eff), lambda i, k: (0, k)),        # b1
                pl.BlockSpec((tdff_eff, d_model), lambda i, k: (k, 0)),  # W2
                pl.BlockSpec((1, d_model), lambda i, k: (0, 0)),         # b2
                pl.BlockSpec((1, d_model), lambda i, k: (0, 0)),         # gamma
                pl.BlockSpec((1, d_model), lambda i, k: (0, 0)),         # beta
            ],
            out_specs=pl.BlockSpec((tm_eff, d_model), lambda i, k: (i, 0)),
            scratch_shapes=[pltpu.VMEM((tm_eff, d_model), jnp.float32)],
        ),
        compiler_params=pltpu.CompilerParams(
            dimension_semantics=("parallel", "arbitrary"),
            vmem_limit_bytes=vmem_limit),
        cost_estimate=cost,
    )(x2d, w1_bf, b1_2d, w2_bf, b2_2d, g_2d, beta_2d)

    return out2d[:M].reshape(batch, seq, d_model)


def init_params(key, d_model, dff):
    """Deterministic init mimicking nn.Linear defaults (uniform +/-1/sqrt(fan_in))."""
    k1, k2, k3, k4 = jax.random.split(key, 4)
    lim1 = 1.0 / jnp.sqrt(d_model)
    lim2 = 1.0 / jnp.sqrt(dff)
    # Stored already transposed to (in, out) so the kernel does x @ W.
    w1 = jax.random.uniform(k1, (d_model, dff), jnp.float32, -lim1, lim1)
    b1 = jax.random.uniform(k2, (dff,), jnp.float32, -lim1, lim1)
    w2 = jax.random.uniform(k3, (dff, d_model), jnp.float32, -lim2, lim2)
    b2 = jax.random.uniform(k4, (d_model,), jnp.float32, -lim2, lim2)
    gamma = jnp.ones((d_model,), jnp.float32)    # LayerNorm weight
    beta = jnp.zeros((d_model,), jnp.float32)    # LayerNorm bias
    return w1, b1, w2, b2, gamma, beta


def _layernorm(y, gamma, beta, eps):
    mean = jnp.mean(y, axis=-1, keepdims=True)
    var = jnp.mean((y - mean) ** 2, axis=-1, keepdims=True)
    return (y - mean) / jnp.sqrt(var + eps) * gamma + beta


def ffn_reference_f32(x, w1, b1, w2, b2, gamma, beta, eps=1e-5):
    """Pure f32 reference (PyTorch eval-mode semantics)."""
    h = jnp.maximum(x @ w1 + b1, 0.0)
    out = h @ w2 + b2
    return _layernorm(x + out, gamma, beta, eps)


def ffn_reference_bf16(x, w1, b1, w2, b2, gamma, beta, eps=1e-5):
    """Reference with the same bf16 matmul operand rounding as the kernel."""
    xb = x.astype(jnp.bfloat16).astype(jnp.float32)
    w1b = w1.astype(jnp.bfloat16).astype(jnp.float32)
    w2b = w2.astype(jnp.bfloat16).astype(jnp.float32)
    h = jnp.maximum(xb @ w1b + b1, 0.0)
    hb = h.astype(jnp.bfloat16).astype(jnp.float32)
    out = hb @ w2b + b2
    return _layernorm(x + out, gamma, beta, eps)


if __name__ == "__main__":
    batch, seq, d_model, dff = 2, 8, 32, 64

    key = jax.random.PRNGKey(0)
    kx, kp = jax.random.split(key)
    x = jax.random.normal(kx, (batch, seq, d_model), jnp.float32)
    params = init_params(kp, d_model, dff)

    out = ffn_forward(x, *params)
    out = jax.block_until_ready(out)
    assert out.shape == (batch, seq, d_model)
    assert not bool(jnp.any(jnp.isnan(out))), "NaNs in kernel output"

    # Tight check against a reference using the same bf16 matmul rounding.
    ref_bf16 = ffn_reference_bf16(x, *params)
    assert jnp.allclose(out, ref_bf16, atol=1e-3, rtol=1e-3), \
        "mismatch vs bf16-matched reference"

    # Looser sanity check against the exact f32 module semantics
    # (difference is only bf16 operand rounding in the two matmuls).
    ref_f32 = ffn_reference_f32(x, *params)
    assert jnp.allclose(out, ref_f32, atol=1e-1, rtol=1e-1), \
        "mismatch vs f32 reference"

    print("KERNEL_OK")
</pallas_src>

<mosaic_0001>
module attributes {stable_mosaic.version = 11 : i64} {
  func.func @ffn_kernel(%arg0: i32, %arg1: i32, %arg2: memref<16x32xf32, #tpu.memory_space<vmem>>, %arg3: memref<32x64xbf16, #tpu.memory_space<vmem>>, %arg4: memref<1x64xf32, #tpu.memory_space<vmem>>, %arg5: memref<64x32xbf16, #tpu.memory_space<vmem>>, %arg6: memref<1x32xf32, #tpu.memory_space<vmem>>, %arg7: memref<1x32xf32, #tpu.memory_space<vmem>>, %arg8: memref<1x32xf32, #tpu.memory_space<vmem>>, %arg9: memref<16x32xf32, #tpu.memory_space<vmem>>, %arg10: memref<16x32xf32, #tpu.memory_space<vmem>>) attributes {dimension_semantics = [#tpu.dimension_semantics<parallel>, #tpu.dimension_semantics<arbitrary>], iteration_bounds = array<i64: 1, 1>, scalar_prefetch = 0 : i64, scratch_operands = 1 : i64, tpu.core_type = #tpu.core_type<tc>, window_params = [{transform_indices = @transform_0, window_bounds = array<i64: 16, 32>}, {transform_indices = @transform_1, window_bounds = array<i64: 32, 64>}, {transform_indices = @transform_2, window_bounds = array<i64: 1, 64>}, {transform_indices = @transform_3, window_bounds = array<i64: 64, 32>}, {pipeline_mode = #tpu.pipeline_mode<synchronous>, transform_indices = @transform_4, window_bounds = array<i64: 1, 32>}, {pipeline_mode = #tpu.pipeline_mode<synchronous>, transform_indices = @transform_5, window_bounds = array<i64: 1, 32>}, {pipeline_mode = #tpu.pipeline_mode<synchronous>, transform_indices = @transform_6, window_bounds = array<i64: 1, 32>}, {transform_indices = @transform_7, window_bounds = array<i64: 16, 32>}]} {
    %c0_i32 = arith.constant 0 : i32
    %0 = arith.cmpi eq, %arg1, %c0_i32 : i32
    %1 = arith.extui %0 : i1 to i32
    %c0_i32_0 = arith.constant 0 : i32
    %2 = arith.cmpi ne, %1, %c0_i32_0 : i32
    scf.if %2 {
      %c0_16 = arith.constant 0 : index
      %c0_17 = arith.constant 0 : index
      %21 = vector.load %arg2[%c0_16, %c0_17] : memref<16x32xf32, #tpu.memory_space<vmem>>, vector<16x32xf32>
      %c0_18 = arith.constant 0 : index
      %c0_19 = arith.constant 0 : index
      %22 = vector.load %arg6[%c0_18, %c0_19] : memref<1x32xf32, #tpu.memory_space<vmem>>, vector<1x32xf32>
      %23 = vector.broadcast %22 : vector<1x32xf32> to vector<16x32xf32>
      %24 = arith.addf %21, %23 : vector<16x32xf32>
      %c0_20 = arith.constant 0 : index
      %c0_21 = arith.constant 0 : index
      %25 = vector.load %arg10[%c0_20, %c0_21] : memref<16x32xf32, #tpu.memory_space<vmem>>, vector<16x32xf32>
      tpu.vector_store %arg10[%c0_20, %c0_21], %24 {strides = array<i32>} : memref<16x32xf32, #tpu.memory_space<vmem>>, vector<16x32xf32>,
    } else {
    }
    %c0 = arith.constant 0 : index
    %c0_1 = arith.constant 0 : index
    %3 = vector.load %arg2[%c0, %c0_1] : memref<16x32xf32, #tpu.memory_space<vmem>>, vector<16x32xf32>
    %4 = arith.truncf %3 : vector<16x32xf32> to vector<16x32xbf16>
    %c0_2 = arith.constant 0 : index
    %c0_3 = arith.constant 0 : index
    %5 = vector.load %arg3[%c0_2, %c0_3] : memref<32x64xbf16, #tpu.memory_space<vmem>>, vector<32x64xbf16>
    %cst = arith.constant dense<0.000000e+00> : vector<16x64xf32>
    %6 = tpu.matmul %4, %5, %cst {dimension_numbers = #tpu.dot_dimension_numbers<[1], [0], [0], [1], [0, 0, 1, 1], [], []>} : vector<16x32xbf16>, vector<32x64xbf16>, vector<16x64xf32> -> vector<16x64xf32>
    %c0_4 = arith.constant 0 : index
    %c0_5 = arith.constant 0 : index
    %7 = vector.load %arg4[%c0_4, %c0_5] : memref<1x64xf32, #tpu.memory_space<vmem>>, vector<1x64xf32>
    %8 = vector.broadcast %7 : vector<1x64xf32> to vector<16x64xf32>
    %9 = arith.addf %6, %8 : vector<16x64xf32>
    %cst_6 = arith.constant 0.000000e+00 : f32
    %10 = vector.broadcast %cst_6 : f32 to vector<16x64xf32>
    %11 = arith.maximumf %9, %10 : vector<16x64xf32>
    %c0_7 = arith.constant 0 : index
    %c0_8 = arith.constant 0 : index
    %12 = vector.load %arg10[%c0_7, %c0_8] : memref<16x32xf32, #tpu.memory_space<vmem>>, vector<16x32xf32>
    %13 = arith.truncf %11 : vector<16x64xf32> to vector<16x64xbf16>
    %c0_9 = arith.constant 0 : index
    %c0_10 = arith.constant 0 : index
    %14 = vector.load %arg5[%c0_9, %c0_10] : memref<64x32xbf16, #tpu.memory_space<vmem>>, vector<64x32xbf16>
    %cst_11 = arith.constant dense<0.000000e+00> : vector<16x32xf32>
    %15 = tpu.matmul %13, %14, %cst_11 {dimension_numbers = #tpu.dot_dimension_numbers<[1], [0], [0], [1], [0, 0, 1, 1], [], []>} : vector<16x64xbf16>, vector<64x32xbf16>, vector<16x32xf32> -> vector<16x32xf32>
    %16 = arith.addf %12, %15 : vector<16x32xf32>
    %c0_12 = arith.constant 0 : index
    %c0_13 = arith.constant 0 : index
    %17 = vector.load %arg10[%c0_12, %c0_13] : memref<16x32xf32, #tpu.memory_space<vmem>>, vector<16x32xf32>
    tpu.vector_store %arg10[%c0_12, %c0_13], %16 {strides = array<i32>} : memref<16x32xf32, #tpu.memory_space<vmem>>, vector<16x32xf32>,
    %c0_i32_14 = arith.constant 0 : i32
    %18 = arith.cmpi eq, %arg1, %c0_i32_14 : i32
    %19 = arith.extui %18 : i1 to i32
    %c0_i32_15 = arith.constant 0 : i32
    %20 = arith.cmpi ne, %19, %c0_i32_15 : i32
    scf.if %20 {
      %c0_16 = arith.constant 0 : index
      %c0_17 = arith.constant 0 : index
      %21 = vector.load %arg10[%c0_16, %c0_17] : memref<16x32xf32, #tpu.memory_space<vmem>>, vector<16x32xf32>
      %cst_18 = arith.constant dense<0.000000e+00> : vector<16xf32>
      %22 = vector.multi_reduction <add>, %21, %cst_18 [1] : vector<16x32xf32> to vector<16xf32>
      %23 = vector.shape_cast %22 : vector<16xf32> to vector<16x1xf32>
      %cst_19 = arith.constant 3.200000e+01 : f32
      %24 = vector.broadcast %cst_19 : f32 to vector<16x1xf32>
      %25 = arith.divf %23, %24 : vector<16x1xf32>
      %26 = vector.broadcast %25 : vector<16x1xf32> to vector<16x32xf32>
      %27 = arith.subf %21, %26 : vector<16x32xf32>
      %28 = vector.broadcast %25 : vector<16x1xf32> to vector<16x32xf32>
      %29 = arith.subf %21, %28 : vector<16x32xf32>
      %30 = arith.mulf %27, %29 : vector<16x32xf32>
      %cst_20 = arith.constant dense<0.000000e+00> : vector<16xf32>
      %31 = vector.multi_reduction <add>, %30, %cst_20 [1] : vector<16x32xf32> to vector<16xf32>
      %32 = vector.shape_cast %31 : vector<16xf32> to vector<16x1xf32>
      %cst_21 = arith.constant 3.200000e+01 : f32
      %33 = vector.broadcast %cst_21 : f32 to vector<16x1xf32>
      %34 = arith.divf %32, %33 : vector<16x1xf32>
      %35 = vector.broadcast %25 : vector<16x1xf32> to vector<16x32xf32>
      %36 = arith.subf %21, %35 : vector<16x32xf32>
      %cst_22 = arith.constant 9.99999974E-6 : f32
      %37 = vector.broadcast %cst_22 : f32 to vector<16x1xf32>
      %38 = arith.addf %34, %37 : vector<16x1xf32>
      %39 = math.rsqrt %38 : vector<16x1xf32>
      %40 = vector.broadcast %39 : vector<16x1xf32> to vector<16x32xf32>
      %41 = arith.mulf %36, %40 : vector<16x32xf32>
      %c0_23 = arith.constant 0 : index
      %c0_24 = arith.constant 0 : index
      %42 = vector.load %arg7[%c0_23, %c0_24] : memref<1x32xf32, #tpu.memory_space<vmem>>, vector<1x32xf32>
      %43 = vector.broadcast %42 : vector<1x32xf32> to vector<16x32xf32>
      %44 = arith.mulf %41, %43 : vector<16x32xf32>
      %c0_25 = arith.constant 0 : index
      %c0_26 = arith.constant 0 : index
      %45 = vector.load %arg8[%c0_25, %c0_26] : memref<1x32xf32, #tpu.memory_space<vmem>>, vector<1x32xf32>
      %46 = vector.broadcast %45 : vector<1x32xf32> to vector<16x32xf32>
      %47 = arith.addf %44, %46 : vector<16x32xf32>
      %c0_27 = arith.constant 0 : index
      %c0_28 = arith.constant 0 : index
      %48 = vector.load %arg9[%c0_27, %c0_28] : memref<16x32xf32, #tpu.memory_space<vmem>>, vector<16x32xf32>
      tpu.vector_store %arg9[%c0_27, %c0_28], %47 {strides = array<i32>} : memref<16x32xf32, #tpu.memory_space<vmem>>, vector<16x32xf32>,
    } else {
    }
    return
  }
  func.func @transform_0(%arg0: i32, %arg1: i32) -> (i32, i32) {
    %c0_i32 = arith.constant 0 : i32
    %c0_i32_0 = arith.constant 0 : i32
    return %arg0, %c0_i32 : i32, i32
  }
  func.func @transform_1(%arg0: i32, %arg1: i32) -> (i32, i32) {
    %c0_i32 = arith.constant 0 : i32
    %c0_i32_0 = arith.constant 0 : i32
    return %c0_i32, %arg1 : i32, i32
  }
  func.func @transform_2(%arg0: i32, %arg1: i32) -> (i32, i32) {
    %c0_i32 = arith.constant 0 : i32
    %c0_i32_0 = arith.constant 0 : i32
    return %c0_i32, %arg1 : i32, i32
  }
  func.func @transform_3(%arg0: i32, %arg1: i32) -> (i32, i32) {
    %c0_i32 = arith.constant 0 : i32
    %c0_i32_0 = arith.constant 0 : i32
    return %arg1, %c0_i32 : i32, i32
  }
  func.func @transform_4(%arg0: i32, %arg1: i32) -> (i32, i32) {
    %c0_i32 = arith.constant 0 : i32
    %c0_i32_0 = arith.constant 0 : i32
    %c0_i32_1 = arith.constant 0 : i32
    return %c0_i32, %c0_i32_0 : i32, i32
  }
  func.func @transform_5(%arg0: i32, %arg1: i32) -> (i32, i32) {
    %c0_i32 = arith.constant 0 : i32
    %c0_i32_0 = arith.constant 0 : i32
    %c0_i32_1 = arith.constant 0 : i32
    return %c0_i32, %c0_i32_0 : i32, i32
  }
  func.func @transform_6(%arg0: i32, %arg1: i32) -> (i32, i32) {
    %c0_i32 = arith.constant 0 : i32
    %c0_i32_0 = arith.constant 0 : i32
    %c0_i32_1 = arith.constant 0 : i32
    return %c0_i32, %c0_i32_0 : i32, i32
  }
  func.func @transform_7(%arg0: i32, %arg1: i32) -> (i32, i32) {
    %c0_i32 = arith.constant 0 : i32
    %c0_i32_0 = arith.constant 0 : i32
    return %arg0, %c0_i32 : i32, i32
  }
}

</mosaic_0001>

<bundles_post_ra>
// kernel: tpu_custom_call.1
= control target key start
LH: loop header
LB: loop body
LE: loop exit
PB: predicated region body
PF: predicated region fallthrough
CT: control target
= control target key end

     0   :  { %s397_s0 = inlined_call_operand.vmem [shape: f32[16,32], index: 0, kind: input, shape index: {}]   ;;  %s398_s1 = inlined_call_operand.vmem [shape: bf16[32,64], index: 1, kind: input, shape index: {}]   ;;  %s399_s2 = inlined_call_operand.vmem [shape: f32[1,64], index: 2, kind: input, shape index: {}]   ;;  %s400_s3 = inlined_call_operand.vmem [shape: bf16[64,32], index: 3, kind: input, shape index: {}]   ;;  %s401_s4 = inlined_call_operand.vmem [shape: f32[1,32], index: 4, kind: input, shape index: {}]   ;;  %s402_s5 = inlined_call_operand.vmem [shape: f32[1,32], index: 5, kind: input, shape index: {}]   ;;  %s403_s6 = inlined_call_operand.vmem [shape: f32[1,32], index: 6, kind: input, shape index: {}]   ;;  %s404_s7 = inlined_call_operand.hbm [shape: f32[16,32], index: 7, kind: output, shape index: {}]  }
   0x1   :  { %v258_v0 = vld [vmem:[%s398_s1 + $0x8] sm:$0xff]  ;;  %v257_v1 = vld [vmem:[%s398_s1] sm:$0xff] }
   0x2   :  { %v43_v2 = vld [vmem:[%s397_s0] sm:$0xff]  ;;  %v44_v3 = vld [vmem:[%s397_s0 + $0x8] sm:$0xff]  ;;  %76 = vmatpush.bf16.msra.mxu0 %v258_v0 }
   0x3   :  { %12 = vsyncpa [#allocation4], 0  ;;  %v45_v4 = vpack.c.bf16 %v44_v3, %v43_v2  ;;  %vm40_vm0 = vcmask 261120   ;;  %v262_v5 = vld [vmem:[%s400_s3 + $0x18] sm:$0xff]  ;;  %v261_v6 = vld [vmem:[%s400_s3 + $0x10] sm:$0xff]  ;;  %vm121_vm1 = vcmask 523264  }
   0x4   :  { %129 = vmatpush.bf16.msra.mxu1 %v262_v5  ;;  %v260_v7 = vld [vmem:[%s400_s3 + $0x8] sm:$0xff]  ;;  %v259_v8 = vld [vmem:[%s400_s3] sm:$0xff]  ;;  %v303_v30 = vmov 32.0   ;;  %s219_s23 = sshll.u32 %s404_s7, 4  ;;  %s306_s24 = smov 8   ;;  %s220_s23 = int_to_ptr.hbm [resolvable:$true] %s219_s23 }
   0x5   :  { %v268_v9 = vld [vmem:[%s401_s4] ss:$0 sm:$0xff]  ;;  %271 = vrcp.f32 %v303_v30 }
   0x6   :  { %77 = vmatpush.bf16.msra.mxu0 %v257_v1  ;;  %v38_v10 = vadd.f32 %v268_v9, %v43_v2  ;;  %v267_v12 = vld [vmem:[%s399_s2] ss:$0 sm:$0xff]  ;;  %v39_v19 = vadd.f32 %v268_v9, %v44_v3 }
   0x7   :  { %v269_v61 = vld [vmem:[%s402_s5] ss:$0 sm:$0xff]  ;;  %s304_s5 = smov [#allocation3]  }
   0x8   :  { %130 = vmatpush.bf16.msra.mxu1 %v261_v6  ;;  %41 = vst.msk [vmem:[#allocation2] sm:$0xff] %vm40_vm0, %v38_v10  ;;  %v270_v1 = vld [vmem:[%s403_s6] ss:$0 sm:$0xff]  ;;  %s217_s20 = sshll.u32 %s304_s5, 4  ;;  %s305_s6 = smov 128   ;;  %s218_s20 = int_to_ptr.vmem [resolvable:$true] %s217_s20 }
   0x9   :  { %239 = vmatmul.msk.bf16.vlgmr.msra.gmra.mxu0 %vm40_vm0, %v45_v4  ;;  %42 = vst.msk [vmem:[#allocation2 + $0x8] sm:$0xff] %vm40_vm0, %v39_v19 }
   0xb   :  { %v272_v31 = vpop.eup %271 }
   0xc   :  { %131 = vmatpush.bf16.msra.mxu1 %v260_v7  ;;  %v155_v32 = vmul.f32 32.0, %v272_v31  ;;  %vm159_vm2 = vweird.f32 %v272_v31 }
   0xe   :  { %v156_v33 = vsub.f32 1.0, %v155_v32 }
   0xf   :  { %v86_v20 = vld [vmem:[#allocation2] sm:$0xff] }
  0x10   :  { %132 = vmatpush.bf16.msra.mxu1 %v259_v8  ;;  %v87_v23 = vld [vmem:[#allocation2 + $0x8] sm:$0xff]  ;;  %v157_v34 = vmul.f32 %v272_v31, %v156_v33 }
  0x12   :  { %v158_v35 = vadd.f32 %v272_v31, %v157_v34 }
  0x14   :  { %v160_v36 = vsel %vm159_vm2, %v272_v31, %v158_v35 }
  0x86   :  { %v79_v11 = vpop.f32.mrf.mxu0 }
  0x87   :  { %v80_v13 = vadd.f32 %v267_v12, %v79_v11 }
  0x89   :  { %v84_v16 = vmax.f32 %v80_v13, 0.0 }
  0x8e   :  { %v81_v14 = vpop.f32.mrf.mxu0 }
  0x8f   :  { %v82_v15 = vadd.f32 %v267_v12, %v81_v14 }
  0x91   :  { %v85_v17 = vmax.f32 %v82_v15, 0.0 }
  0x93   :  { %v88_v18 = vpack.c.bf16 %v85_v17, %v84_v16 }
  0x95   :  { %256 = vmatmul.msk.bf16.vlgmr.msra.gmra.mxu1 %vm121_vm1, %v88_v18 }
 0x112   :  { %v134_v21 = vpop.f32.mrf.mxu1 }
 0x113   :  { %v139_v22 = vadd.f32 %v134_v21, %v86_v20 }
 0x115   :  { %141 = vst.msk [vmem:[#allocation2] sm:$0xff] %vm40_vm0, %v139_v22 }
 0x11a   :  { %v136_v24 = vpop.f32.mrf.mxu1 }
 0x11b   :  { %v140_v25 = vadd.f32 %v136_v24, %v87_v23 }
 0x11c   :  { %v146_v26 = vld [vmem:[#allocation2] sm:$0xff] }
 0x11d   :  { %142 = vst.msk [vmem:[#allocation2 + $0x8] sm:$0xff] %vm40_vm0, %v140_v25  ;;  %v148_v27 = vsel %vm40_vm0, %v146_v26, 0.0 }
 0x11e   :  { %149 = vadd.xlane.f32.xlu0 %v148_v27 }
 0x124   :  { %v147_v28 = vld [vmem:[#allocation2 + $0x8] sm:$0xff] }
 0x125   :  { %v151_v29 = vsel %vm40_vm0, %v147_v28, 0.0 }
 0x126   :  { %152 = vadd.xlane.f32.xlu0 %v151_v29 }
 0x191   :  { %v150_v37 = vpop.xlane.xlu0 %149 }
 0x192   :  { %v161_v38 = vmul.f32 %v160_v36, %v150_v37 }
 0x194   :  { %v163_v39 = vsub.f32 %v146_v26, %v161_v38 }
 0x196   :  { %v165_v40 = vmul.f32 %v163_v39, %v163_v39 }
 0x198   :  { %v167_v41 = vsel %vm40_vm0, %v165_v40, 0.0 }
 0x199   :  { %168 = vadd.xlane.f32.xlu1 %v167_v41  ;;  %v153_v42 = vpop.xlane.xlu0 %152 }
 0x19a   :  { %v162_v43 = vmul.f32 %v160_v36, %v153_v42 }
 0x19c   :  { %v164_v44 = vsub.f32 %v147_v28, %v162_v43 }
 0x19e   :  { %v166_v45 = vmul.f32 %v164_v44, %v164_v44 }
 0x1a0   :  { %v170_v46 = vsel %vm40_vm0, %v166_v45, 0.0 }
 0x1a1   :  { %171 = vadd.xlane.f32.xlu1 %v170_v46 }
 0x20c   :  { %v169_v47 = vpop.xlane.xlu1 %168 }
 0x20d   :  { %v173_v48 = vmul.f32 %v169_v47, %v160_v36 }
 0x20f   :  { %v175_v49 = vadd.f32 1e-05, %v173_v48 }
 0x211   :  { %273 = vrsqrt.f32 %v175_v49  ;;  %vm183_vm4 = vweird.f32 %v175_v49 }
 0x214   :  { %v172_v50 = vpop.xlane.xlu1 %171 }
 0x215   :  { %v174_v51 = vmul.f32 %v172_v50, %v160_v36 }
 0x217   :  { %v274_v52 = vpop.eup %273  ;;  %v176_v53 = vadd.f32 1e-05, %v174_v51 }
 0x218   :  { %v178_v54 = vmul.f32 %v274_v52, %v175_v49  ;;  %vm184_vm3 = vweird.f32 %v274_v52 }
 0x219   :  { %275 = vrsqrt.f32 %v176_v53  ;;  %vm185_vm5 = vmor %vm183_vm4, %vm184_vm3  ;;  %vm193_vm7 = vweird.f32 %v176_v53 }
 0x21a   :  { %v179_v55 = vmul.f32 %v274_v52, %v178_v54 }
 0x21c   :  { %v180_v56 = vmul.f32 0.5, %v179_v55 }
 0x21e   :  { %v181_v57 = vsub.f32 1.5, %v180_v56 }
 0x21f   :  { %v276_v58 = vpop.eup %275 }
 0x220   :  { %v182_v59 = vmul.f32 %v274_v52, %v181_v57  ;;  %v188_v60 = vmul.f32 %v276_v58, %v176_v53  ;;  %vm194_vm6 = vweird.f32 %v276_v58 }
 0x221   :  { %vm195_vm8 = vmor %vm193_vm7, %vm194_vm6 }
 0x222   :  { %v186_v62 = vsel %vm185_vm5, %v274_v52, %v182_v59  ;;  %v189_v63 = vmul.f32 %v276_v58, %v188_v60 }
 0x223   :  { %v197_v0 = vmul.f32 %v186_v62, %v163_v39 }
 0x224   :  { %v190_v2 = vmul.f32 0.5, %v189_v63 }
 0x225   :  { %v203_v3 = vmul.f32 %v269_v61, %v197_v0 }
 0x226   :  { %v191_v4 = vsub.f32 1.5, %v190_v2 }
 0x227   :  { %v209_v5 = vadd.f32 %v270_v1, %v203_v3 }
 0x228   :  { %v192_v6 = vmul.f32 %v276_v58, %v191_v4 }
 0x229   :  { %211 = vst.msk [vmem:[#allocation3] sm:$0xff] %vm40_vm0, %v209_v5 }
 0x22a   :  { %v196_v7 = vsel %vm195_vm8, %v276_v58, %v192_v6 }
 0x22b   :  { %v198_v8 = vmul.f32 %v196_v7, %v164_v44 }
 0x22d   :  { %v204_v9 = vmul.f32 %v269_v61, %v198_v8 }
 0x22f   :  { %v210_v10 = vadd.f32 %v270_v1, %v204_v9 }
 0x231   :  { %212 = vst.msk [vmem:[#allocation3 + $0x8] sm:$0xff] %vm40_vm0, %v210_v10 }
 0x232   :  { %225 = dma.vmem_to_hbm [thread:$0]  %s218_s20, 256, %s220_s23, [#allocation4], %s305_s6, %s305_s6, %s306_s24  }
 0x233   :  { %301 = dma.done.wait [#allocation4], 256  }
 0x234   :  { %302 = vsyncadd [#allocation4], 4294967040 }
 0x235   :  { %230 = vsyncpa [#allocation4], 1 }

</bundles_post_ra>
